<compile_context>
chip_gen: v6e
topology: v6e:2x2x1
jax: 0.10.0
libtpu: 0.0.40
codegen_flags: <defaults>
</compile_context>

<pallas_src>
import numpy as np
import jax
import jax.numpy as jnp
from jax import lax
from jax.experimental import pallas as pl
from jax.experimental.pallas import tpu as pltpu


def _round_up(v, m):
    return ((int(v) + m - 1) // m) * m


def _conv_out_len(L, k, stride, padding, dilation):
    return int(np.floor((L + 2 * padding - dilation * (k - 1) - 1) / stride + 1))


def _layer_lengths(input_size, n_layers_req, kernel_size, stride, padding, dilation):
    """Replicates the length bookkeeping in conv_nnet.__init__."""
    if input_size + 2 * padding > dilation * (kernel_size - 1):
        lens = [int(input_size)]
        n = 0
        while n < n_layers_req and lens[n] + 2 * padding > dilation * (kernel_size - 1):
            lens.append(_conv_out_len(lens[n], kernel_size, stride, padding, dilation))
            n += 1
        n_layers = n
        assert all(l > 0 for l in lens[1:n_layers + 1])
        return n_layers, lens[:n_layers + 1]
    else:
        return 0, [int(input_size)]


def _choose_batch_tile(B):
    """Batch tile (multiple of 8, <=128) and padded batch.  Prefers >=2 grid
    steps so the ("parallel",) axis can shard across both v7x TensorCores."""
    b8 = _round_up(max(int(B), 1), 8)
    if b8 <= 8:
        BT = 8
    elif b8 <= 256:
        BT = min(128, _round_up((b8 + 1) // 2, 8))
    else:
        BT = 128
    B_pad = _round_up(b8, BT)
    return BT, B_pad


def _make_kernel(BT, lens, kernel_size, stride, padding, dilation, nonlinearity,
                 BASE, W_buf, K_pad, L_in, STRIP=8):
    n_layers = len(lens) - 1
    act = jnp.tanh if nonlinearity == 'Tanh' else (lambda v: jnp.maximum(v, 0.0))
    n_strips = BT // STRIP
    tap0 = BASE - padding          # lane where the (virtually) zero-padded input starts

    def kernel(conv_w_ref, conv_b_ref, x_ref, fc_w_ref, fc_b_ref, y_ref, buf_ref):
        # Build the padded activation slab in VMEM: zero once (doubles as the
        # conv zero-padding and keeps stale-VMEM garbage out of the lanes the
        # zero fc-weight rows mask), then drop the x block into the interior.
        buf_ref[...] = jnp.zeros_like(buf_ref)
        buf_ref[:, pl.ds(BASE, L_in)] = x_ref[...]

        # Hoist SMEM scalar reads out of the strip/layer/tap loops.
        w = [conv_w_ref[t] for t in range(kernel_size)]
        b = conv_b_ref[0]
        right_zero = (jnp.zeros((STRIP, padding), jnp.float32)
                      if padding > 0 else None)              # hoisted, created once

        def process_strip(row):
            for layer in range(n_layers):                    # statically unrolled
                L_out = lens[layer + 1]
                if stride == 1:
                    W_a = _round_up(L_out, 128)              # trimmed, lane-aligned width
                    taps = [buf_ref[pl.ds(row, STRIP),
                                    pl.ds(tap0 + t * dilation, W_a)]
                            for t in range(kernel_size)]
                    store_w = W_a
                else:
                    # TODO(synk): stride>1 lane reads use strided pl.ds but are
                    # not exercised/validated by the test below.
                    taps = [buf_ref[pl.ds(row, STRIP),
                                    pl.ds(tap0 + t * dilation, L_out, stride=stride)]
                            for t in range(kernel_size)]
                    store_w = L_out

                acc = w[0] * taps[0]
                for t in range(1, kernel_size):
                    acc = acc + w[t] * taps[t]
                acc = act(acc + b)

                # Lane-aligned (BASE is a multiple of 128) unmasked writeback.
                buf_ref[pl.ds(row, STRIP), pl.ds(BASE, store_w)] = acc
                if padding > 0:
                    # Re-zero the right pad region the next layer reads.
                    buf_ref[pl.ds(row, STRIP), pl.ds(BASE + L_out, padding)] = right_zero

        if n_layers > 0:
            if n_strips == 1:
                process_strip(0)
            else:
                # Strip-wise processing bounds live vregs (taps + acc) to a few
                # rows at a time; all state lives in the VMEM slab.
                def body(s, carry):
                    process_strip(pl.multiple_of(s * STRIP, STRIP))
                    return carry
                lax.fori_loop(0, n_strips, body, 0)

        # Fully connected layer on the MXU, contracting only the K_pad lanes
        # that can be non-zero in the padded fc weights.
        h = buf_ref[:, pl.ds(0, K_pad)]                      # (BT, K_pad)
        y = jnp.dot(h, fc_w_ref[...], preferred_element_type=jnp.float32)
        y_ref[...] = (y + fc_b_ref[...]).astype(y_ref.dtype)

    return kernel


def conv_nnet_forward(x, conv_w, conv_b, fc_w, fc_b, *,
                      n_layers_req, kernel_size, stride=1, padding=0,
                      dilation=1, nonlinearity='Tanh'):
    """x: (B, 1, L) float32.  Returns (B, 1, output_size) float32."""
    B, C, L = x.shape
    assert C == 1
    output_size = int(fc_b.shape[-1])
    n_layers, lens = _layer_lengths(L, n_layers_req, kernel_size, stride,
                                    padding, dilation)
    fc_in = lens[-1]
    assert fc_w.shape == (output_size, fc_in)

    BT, B_pad = _choose_batch_tile(B)
    n_btiles = B_pad // BT

    # Slab layout: activation starts at lane BASE (128-aligned when padding>0
    # so per-layer writebacks are unmasked); left zero pad lives just below it.
    BASE = _round_up(padding, 128) if padding > 0 else 0
    K_pad = _round_up(BASE + fc_in, 128)          # trimmed fc contraction width
    OUT_pad = _round_up(output_size, 128)         # lane-dense output slab

    # Working slab width: cover every static per-layer read/write plus fc read.
    req = max(BASE + L, K_pad)
    for l in range(n_layers):
        L_out = lens[l + 1]
        if stride == 1:
            req = max(req, BASE - padding + (kernel_size - 1) * dilation
                      + _round_up(L_out, 128))
        else:
            req = max(req, BASE - padding + (kernel_size - 1) * dilation
                      + stride * (L_out - 1) + 1)
        req = max(req, BASE + L_out + padding)
    W_buf = _round_up(req, 128)

    # Inputs: plain (B_pad, L) activation (no HBM-inflated slab), SMEM conv
    # scalars, fc weight pre-transposed into a zero-padded (K_pad, OUT_pad)
    # slab so stale tail lanes of the activation buffer contribute nothing.
    x2d = jnp.zeros((B_pad, L), jnp.float32)
    x2d = x2d.at[:B].set(x[:, 0, :].astype(jnp.float32))

    conv_w1 = conv_w.reshape(kernel_size).astype(jnp.float32)    # (k,)  -> SMEM
    conv_b1 = conv_b.reshape(1).astype(jnp.float32)              # (1,)  -> SMEM

    fc_w_pad = jnp.zeros((K_pad, OUT_pad), jnp.float32)
    fc_w_pad = fc_w_pad.at[BASE:BASE + fc_in, :output_size].set(
        fc_w.T.astype(jnp.float32))
    fc_b_pad = jnp.zeros((1, OUT_pad), jnp.float32)
    fc_b_pad = fc_b_pad.at[0, :output_size].set(fc_b.astype(jnp.float32))

    # Scoped VMEM budget from the actual slab sizes (generous headroom; the
    # constant fc operands are counted double-buffered for the fallback path).
    vmem_bytes = 4 * (2 * BT * L + 2 * BT * OUT_pad + 2 * K_pad * OUT_pad
                      + 2 * OUT_pad + BT * W_buf)
    vmem_limit = int(min(96 * 2**20, max(32 * 2**20, 2 * vmem_bytes)))

    kernel = _make_kernel(BT, lens, kernel_size, stride, padding, dilation,
                          nonlinearity, BASE, W_buf, K_pad, L)

    def _run(single_buffer_consts):
        const_kwargs = ({'pipeline_mode': pl.Buffered(buffer_count=1)}
                        if single_buffer_consts else {})
        out = pl.pallas_call(
            kernel,
            out_shape=jax.ShapeDtypeStruct((B_pad, OUT_pad), jnp.float32),
            grid=(n_btiles,),
            in_specs=[
                pl.BlockSpec(memory_space=pltpu.MemorySpace.SMEM),   # conv w (k,)
                pl.BlockSpec(memory_space=pltpu.MemorySpace.SMEM),   # conv b (1,)
                pl.BlockSpec((BT, L), lambda i: (i, 0)),             # x (BT, L)
                pl.BlockSpec((K_pad, OUT_pad), lambda i: (0, 0),     # fc weight^T
                             **const_kwargs),
                pl.BlockSpec((1, OUT_pad), lambda i: (0, 0),         # fc bias
                             **const_kwargs),
            ],
            out_specs=pl.BlockSpec((BT, OUT_pad), lambda i: (i, 0)),
            scratch_shapes=[pltpu.VMEM((BT, W_buf), jnp.float32)],
            compiler_params=pltpu.CompilerParams(
                dimension_semantics=("parallel",),
                vmem_limit_bytes=vmem_limit),
        )(conv_w1, conv_b1, x2d, fc_w_pad, fc_b_pad)
        return jax.block_until_ready(out)

    try:
        out = _run(True)
    except Exception:
        # Fallback if this JAX build rejects single-buffered pipeline_mode.
        out = _run(False)

    return out[:B, None, :output_size]


def _reference_forward(x, conv_w, conv_b, fc_w, fc_b, *,
                       n_layers_req, kernel_size, stride, padding, dilation,
                       nonlinearity):
    """Pure-JAX reference mirroring PyTorch Conv1d(1,1,...) + act, repeated,
    then Linear.  Used only for correctness checking."""
    B, _, L = x.shape
    n_layers, lens = _layer_lengths(L, n_layers_req, kernel_size, stride,
                                    padding, dilation)
    act = jnp.tanh if nonlinearity == 'Tanh' else (lambda v: jnp.maximum(v, 0.0))
    h = x[:, 0, :]
    w = conv_w.reshape(kernel_size)
    for layer in range(n_layers):
        L_out = lens[layer + 1]
        if padding > 0:
            h = jnp.pad(h, ((0, 0), (padding, padding)))
        acc = jnp.zeros((B, L_out), jnp.float32)
        for t in range(kernel_size):
            start = t * dilation
            acc = acc + w[t] * h[:, start:start + stride * (L_out - 1) + 1:stride]
        h = act(acc + conv_b.reshape(()))
    y = h @ fc_w.T + fc_b
    return y[:, None, :]


if __name__ == "__main__":
    # Small, deterministic configuration consistent with the module:
    B = 2
    input_size = 16
    output_size = 8
    n_layers_req = 3
    kernel_size = 3
    stride, padding, dilation = 1, 0, 1
    nonlinearity = 'Tanh'

    n_layers, lens = _layer_lengths(input_size, n_layers_req, kernel_size,
                                    stride, padding, dilation)
    fc_in = lens[-1]   # 16 -> 14 -> 12 -> 10

    key = jax.random.PRNGKey(0)
    kx, kcw, kcb, kfw, kfb = jax.random.split(key, 5)

    x = jax.random.normal(kx, (B, 1, input_size), dtype=jnp.float32)

    # Deterministic parameter init (shapes match nn.Conv1d(1,1,k) / nn.Linear)
    conv_bound = 1.0 / np.sqrt(1 * kernel_size)
    conv_w = jax.random.uniform(kcw, (1, 1, kernel_size), jnp.float32,
                                -conv_bound, conv_bound)
    conv_b = jax.random.uniform(kcb, (1,), jnp.float32, -conv_bound, conv_bound)
    fc_bound = 1.0 / np.sqrt(fc_in)
    fc_w = jax.random.uniform(kfw, (output_size, fc_in), jnp.float32,
                              -fc_bound, fc_bound)
    fc_b = jax.random.uniform(kfb, (output_size,), jnp.float32,
                              -fc_bound, fc_bound)

    y = conv_nnet_forward(x, conv_w, conv_b, fc_w, fc_b,
                          n_layers_req=n_layers_req, kernel_size=kernel_size,
                          stride=stride, padding=padding, dilation=dilation,
                          nonlinearity=nonlinearity)
    y = jax.block_until_ready(y)

    y_ref = _reference_forward(x, conv_w, conv_b, fc_w, fc_b,
                               n_layers_req=n_layers_req,
                               kernel_size=kernel_size, stride=stride,
                               padding=padding, dilation=dilation,
                               nonlinearity=nonlinearity)

    assert y.shape == (B, 1, output_size)
    np.testing.assert_allclose(np.asarray(y), np.asarray(y_ref),
                               rtol=1e-5, atol=1e-5)
    print("KERNEL_OK")
</pallas_src>

<mosaic_0001>
module attributes {stable_mosaic.version = 11 : i64} {
  func.func @kernel(%arg0: i32, %arg1: memref<3xf32, #tpu.memory_space<smem>>, %arg2: memref<1xf32, #tpu.memory_space<smem>>, %arg3: memref<8x16xf32, #tpu.memory_space<vmem>>, %arg4: memref<128x128xf32, #tpu.memory_space<vmem>>, %arg5: memref<1x128xf32, #tpu.memory_space<vmem>>, %arg6: memref<8x128xf32, #tpu.memory_space<vmem>>, %arg7: memref<8x256xf32, #tpu.memory_space<vmem>>) attributes {dimension_semantics = [#tpu.dimension_semantics<parallel>], iteration_bounds = array<i64: 1>, scalar_prefetch = 0 : i64, scratch_operands = 1 : i64, tpu.core_type = #tpu.core_type<tc>, window_params = [{transform_indices = @transform_0, window_bounds = array<i64: 3>}, {transform_indices = @transform_1, window_bounds = array<i64: 1>}, {transform_indices = @transform_2, window_bounds = array<i64: 8, 16>}, {pipeline_mode = #tpu.pipeline_mode<synchronous>, transform_indices = @transform_3, window_bounds = array<i64: 128, 128>}, {pipeline_mode = #tpu.pipeline_mode<synchronous>, transform_indices = @transform_4, window_bounds = array<i64: 1, 128>}, {transform_indices = @transform_5, window_bounds = array<i64: 8, 128>}]} {
    %cst = arith.constant 0.000000e+00 : f32
    %0 = vector.broadcast %cst : f32 to vector<8x256xf32>
    %c0 = arith.constant 0 : index
    %c0_0 = arith.constant 0 : index
    %1 = vector.load %arg7[%c0, %c0_0] : memref<8x256xf32, #tpu.memory_space<vmem>>, vector<8x256xf32>
    tpu.vector_store %arg7[%c0, %c0_0], %0 {strides = array<i32>} : memref<8x256xf32, #tpu.memory_space<vmem>>, vector<8x256xf32>,
    %c0_1 = arith.constant 0 : index
    %c0_2 = arith.constant 0 : index
    %2 = vector.load %arg3[%c0_1, %c0_2] : memref<8x16xf32, #tpu.memory_space<vmem>>, vector<8x16xf32>
    %c0_3 = arith.constant 0 : index
    %c0_4 = arith.constant 0 : index
    %3 = vector.load %arg7[%c0_3, %c0_4] : memref<8x256xf32, #tpu.memory_space<vmem>>, vector<8x16xf32>
    tpu.vector_store %arg7[%c0_3, %c0_4], %2 {strides = array<i32>} : memref<8x256xf32, #tpu.memory_space<vmem>>, vector<8x16xf32>,
    %c0_5 = arith.constant 0 : index
    %4 = memref.load %arg1[%c0_5] : memref<3xf32, #tpu.memory_space<smem>>
    %c1 = arith.constant 1 : index
    %5 = memref.load %arg1[%c1] : memref<3xf32, #tpu.memory_space<smem>>
    %c2 = arith.constant 2 : index
    %6 = memref.load %arg1[%c2] : memref<3xf32, #tpu.memory_space<smem>>
    %c0_6 = arith.constant 0 : index
    %7 = memref.load %arg2[%c0_6] : memref<1xf32, #tpu.memory_space<smem>>
    %c0_7 = arith.constant 0 : index
    %c0_8 = arith.constant 0 : index
    %8 = vector.load %arg7[%c0_7, %c0_8] : memref<8x256xf32, #tpu.memory_space<vmem>>, vector<8x128xf32>
    %c0_9 = arith.constant 0 : index
    %c1_10 = arith.constant 1 : index
    %9 = vector.load %arg7[%c0_9, %c1_10] : memref<8x256xf32, #tpu.memory_space<vmem>>, vector<8x128xf32>
    %c0_11 = arith.constant 0 : index
    %c2_12 = arith.constant 2 : index
    %10 = vector.load %arg7[%c0_11, %c2_12] : memref<8x256xf32, #tpu.memory_space<vmem>>, vector<8x128xf32>
    %11 = vector.broadcast %4 : f32 to vector<8x128xf32>
    %12 = arith.mulf %11, %8 : vector<8x128xf32>
    %13 = vector.broadcast %5 : f32 to vector<8x128xf32>
    %14 = arith.mulf %13, %9 : vector<8x128xf32>
    %15 = arith.addf %12, %14 : vector<8x128xf32>
    %16 = vector.broadcast %6 : f32 to vector<8x128xf32>
    %17 = arith.mulf %16, %10 : vector<8x128xf32>
    %18 = arith.addf %15, %17 : vector<8x128xf32>
    %19 = vector.broadcast %7 : f32 to vector<8x128xf32>
    %20 = arith.addf %18, %19 : vector<8x128xf32>
    %21 = math.tanh %20 : vector<8x128xf32>
    %c0_13 = arith.constant 0 : index
    %c0_14 = arith.constant 0 : index
    %22 = vector.load %arg7[%c0_13, %c0_14] : memref<8x256xf32, #tpu.memory_space<vmem>>, vector<8x128xf32>
    tpu.vector_store %arg7[%c0_13, %c0_14], %21 {strides = array<i32>} : memref<8x256xf32, #tpu.memory_space<vmem>>, vector<8x128xf32>,
    %c0_15 = arith.constant 0 : index
    %c0_16 = arith.constant 0 : index
    %23 = vector.load %arg7[%c0_15, %c0_16] : memref<8x256xf32, #tpu.memory_space<vmem>>, vector<8x128xf32>
    %c0_17 = arith.constant 0 : index
    %c1_18 = arith.constant 1 : index
    %24 = vector.load %arg7[%c0_17, %c1_18] : memref<8x256xf32, #tpu.memory_space<vmem>>, vector<8x128xf32>
    %c0_19 = arith.constant 0 : index
    %c2_20 = arith.constant 2 : index
    %25 = vector.load %arg7[%c0_19, %c2_20] : memref<8x256xf32, #tpu.memory_space<vmem>>, vector<8x128xf32>
    %26 = vector.broadcast %4 : f32 to vector<8x128xf32>
    %27 = arith.mulf %26, %23 : vector<8x128xf32>
    %28 = vector.broadcast %5 : f32 to vector<8x128xf32>
    %29 = arith.mulf %28, %24 : vector<8x128xf32>
    %30 = arith.addf %27, %29 : vector<8x128xf32>
    %31 = vector.broadcast %6 : f32 to vector<8x128xf32>
    %32 = arith.mulf %31, %25 : vector<8x128xf32>
    %33 = arith.addf %30, %32 : vector<8x128xf32>
    %34 = vector.broadcast %7 : f32 to vector<8x128xf32>
    %35 = arith.addf %33, %34 : vector<8x128xf32>
    %36 = math.tanh %35 : vector<8x128xf32>
    %c0_21 = arith.constant 0 : index
    %c0_22 = arith.constant 0 : index
    %37 = vector.load %arg7[%c0_21, %c0_22] : memref<8x256xf32, #tpu.memory_space<vmem>>, vector<8x128xf32>
    tpu.vector_store %arg7[%c0_21, %c0_22], %36 {strides = array<i32>} : memref<8x256xf32, #tpu.memory_space<vmem>>, vector<8x128xf32>,
    %c0_23 = arith.constant 0 : index
    %c0_24 = arith.constant 0 : index
    %38 = vector.load %arg7[%c0_23, %c0_24] : memref<8x256xf32, #tpu.memory_space<vmem>>, vector<8x128xf32>
    %c0_25 = arith.constant 0 : index
    %c1_26 = arith.constant 1 : index
    %39 = vector.load %arg7[%c0_25, %c1_26] : memref<8x256xf32, #tpu.memory_space<vmem>>, vector<8x128xf32>
    %c0_27 = arith.constant 0 : index
    %c2_28 = arith.constant 2 : index
    %40 = vector.load %arg7[%c0_27, %c2_28] : memref<8x256xf32, #tpu.memory_space<vmem>>, vector<8x128xf32>
    %41 = vector.broadcast %4 : f32 to vector<8x128xf32>
    %42 = arith.mulf %41, %38 : vector<8x128xf32>
    %43 = vector.broadcast %5 : f32 to vector<8x128xf32>
    %44 = arith.mulf %43, %39 : vector<8x128xf32>
    %45 = arith.addf %42, %44 : vector<8x128xf32>
    %46 = vector.broadcast %6 : f32 to vector<8x128xf32>
    %47 = arith.mulf %46, %40 : vector<8x128xf32>
    %48 = arith.addf %45, %47 : vector<8x128xf32>
    %49 = vector.broadcast %7 : f32 to vector<8x128xf32>
    %50 = arith.addf %48, %49 : vector<8x128xf32>
    %51 = math.tanh %50 : vector<8x128xf32>
    %c0_29 = arith.constant 0 : index
    %c0_30 = arith.constant 0 : index
    %52 = vector.load %arg7[%c0_29, %c0_30] : memref<8x256xf32, #tpu.memory_space<vmem>>, vector<8x128xf32>
    tpu.vector_store %arg7[%c0_29, %c0_30], %51 {strides = array<i32>} : memref<8x256xf32, #tpu.memory_space<vmem>>, vector<8x128xf32>,
    %c0_31 = arith.constant 0 : index
    %c0_32 = arith.constant 0 : index
    %53 = vector.load %arg7[%c0_31, %c0_32] : memref<8x256xf32, #tpu.memory_space<vmem>>, vector<8x128xf32>
    %c0_33 = arith.constant 0 : index
    %c0_34 = arith.constant 0 : index
    %54 = vector.load %arg4[%c0_33, %c0_34] : memref<128x128xf32, #tpu.memory_space<vmem>>, vector<128x128xf32>
    %cst_35 = arith.constant dense<0.000000e+00> : vector<8x128xf32>
    %55 = tpu.matmul %53, %54, %cst_35 {dimension_numbers = #tpu.dot_dimension_numbers<[1], [0], [0], [1], [0, 0, 1, 1], [], []>} : vector<8x128xf32>, vector<128x128xf32>, vector<8x128xf32> -> vector<8x128xf32>
    %c0_36 = arith.constant 0 : index
    %c0_37 = arith.constant 0 : index
    %56 = vector.load %arg5[%c0_36, %c0_37] : memref<1x128xf32, #tpu.memory_space<vmem>>, vector<1x128xf32>
    %57 = vector.broadcast %56 : vector<1x128xf32> to vector<8x128xf32>
    %58 = arith.addf %55, %57 : vector<8x128xf32>
    %c0_38 = arith.constant 0 : index
    %c0_39 = arith.constant 0 : index
    %59 = vector.load %arg6[%c0_38, %c0_39] : memref<8x128xf32, #tpu.memory_space<vmem>>, vector<8x128xf32>
    tpu.vector_store %arg6[%c0_38, %c0_39], %58 {strides = array<i32>} : memref<8x128xf32, #tpu.memory_space<vmem>>, vector<8x128xf32>,
    return
  }
  func.func @transform_0(%arg0: i32) -> i32 {
    %c0_i32 = arith.constant 0 : i32
    %c0_i32_0 = arith.constant 0 : i32
    return %c0_i32 : i32
  }
  func.func @transform_1(%arg0: i32) -> i32 {
    %c0_i32 = arith.constant 0 : i32
    %c0_i32_0 = arith.constant 0 : i32
    return %c0_i32 : i32
  }
  func.func @transform_2(%arg0: i32) -> (i32, i32) {
    %c0_i32 = arith.constant 0 : i32
    %c0_i32_0 = arith.constant 0 : i32
    return %arg0, %c0_i32 : i32, i32
  }
  func.func @transform_3(%arg0: i32) -> (i32, i32) {
    %c0_i32 = arith.constant 0 : i32
    %c0_i32_0 = arith.constant 0 : i32
    %c0_i32_1 = arith.constant 0 : i32
    return %c0_i32, %c0_i32_0 : i32, i32
  }
  func.func @transform_4(%arg0: i32) -> (i32, i32) {
    %c0_i32 = arith.constant 0 : i32
    %c0_i32_0 = arith.constant 0 : i32
    %c0_i32_1 = arith.constant 0 : i32
    return %c0_i32, %c0_i32_0 : i32, i32
  }
  func.func @transform_5(%arg0: i32) -> (i32, i32) {
    %c0_i32 = arith.constant 0 : i32
    %c0_i32_0 = arith.constant 0 : i32
    return %arg0, %c0_i32 : i32, i32
  }
}

module attributes {stable_mosaic.version = 11 : i64} {
  func.func @kernel(%arg0: i32, %arg1: memref<3xf32, #tpu.memory_space<smem>>, %arg2: memref<1xf32, #tpu.memory_space<smem>>, %arg3: memref<8x16xf32, #tpu.memory_space<vmem>>, %arg4: memref<128x128xf32, #tpu.memory_space<vmem>>, %arg5: memref<1x128xf32, #tpu.memory_space<vmem>>, %arg6: memref<8x128xf32, #tpu.memory_space<vmem>>, %arg7: memref<8x256xf32, #tpu.memory_space<vmem>>) attributes {dimension_semantics = [#tpu.dimension_semantics<parallel>], iteration_bounds = array<i64: 1>, scalar_prefetch = 0 : i64, scratch_operands = 1 : i64, tpu.core_type = #tpu.core_type<tc>, window_params = [{transform_indices = @transform_0, window_bounds = array<i64: 3>}, {transform_indices = @transform_1, window_bounds = array<i64: 1>}, {transform_indices = @transform_2, window_bounds = array<i64: 8, 16>}, {pipeline_mode = #tpu.pipeline_mode<synchronous>, transform_indices = @transform_3, window_bounds = array<i64: 128, 128>}, {pipeline_mode = #tpu.pipeline_mode<synchronous>, transform_indices = @transform_4, window_bounds = array<i64: 1, 128>}, {transform_indices = @transform_5, window_bounds = array<i64: 8, 128>}]} {
    %cst = arith.constant 0.000000e+00 : f32
    %0 = vector.broadcast %cst : f32 to vector<8x256xf32>
    %c0 = arith.constant 0 : index
    %c0_0 = arith.constant 0 : index
    %1 = vector.load %arg7[%c0, %c0_0] : memref<8x256xf32, #tpu.memory_space<vmem>>, vector<8x256xf32>
    tpu.vector_store %arg7[%c0, %c0_0], %0 {strides = array<i32>} : memref<8x256xf32, #tpu.memory_space<vmem>>, vector<8x256xf32>,
    %c0_1 = arith.constant 0 : index
    %c0_2 = arith.constant 0 : index
    %2 = vector.load %arg3[%c0_1, %c0_2] : memref<8x16xf32, #tpu.memory_space<vmem>>, vector<8x16xf32>
    %c0_3 = arith.constant 0 : index
    %c0_4 = arith.constant 0 : index
    %3 = vector.load %arg7[%c0_3, %c0_4] : memref<8x256xf32, #tpu.memory_space<vmem>>, vector<8x16xf32>
    tpu.vector_store %arg7[%c0_3, %c0_4], %2 {strides = array<i32>} : memref<8x256xf32, #tpu.memory_space<vmem>>, vector<8x16xf32>,
    %c0_5 = arith.constant 0 : index
    %4 = memref.load %arg1[%c0_5] : memref<3xf32, #tpu.memory_space<smem>>
    %c1 = arith.constant 1 : index
    %5 = memref.load %arg1[%c1] : memref<3xf32, #tpu.memory_space<smem>>
    %c2 = arith.constant 2 : index
    %6 = memref.load %arg1[%c2] : memref<3xf32, #tpu.memory_space<smem>>
    %c0_6 = arith.constant 0 : index
    %7 = memref.load %arg2[%c0_6] : memref<1xf32, #tpu.memory_space<smem>>
    %c0_7 = arith.constant 0 : index
    %c0_8 = arith.constant 0 : index
    %8 = vector.load %arg7[%c0_7, %c0_8] : memref<8x256xf32, #tpu.memory_space<vmem>>, vector<8x128xf32>
    %c0_9 = arith.constant 0 : index
    %c1_10 = arith.constant 1 : index
    %9 = vector.load %arg7[%c0_9, %c1_10] : memref<8x256xf32, #tpu.memory_space<vmem>>, vector<8x128xf32>
    %c0_11 = arith.constant 0 : index
    %c2_12 = arith.constant 2 : index
    %10 = vector.load %arg7[%c0_11, %c2_12] : memref<8x256xf32, #tpu.memory_space<vmem>>, vector<8x128xf32>
    %11 = vector.broadcast %4 : f32 to vector<8x128xf32>
    %12 = arith.mulf %11, %8 : vector<8x128xf32>
    %13 = vector.broadcast %5 : f32 to vector<8x128xf32>
    %14 = arith.mulf %13, %9 : vector<8x128xf32>
    %15 = arith.addf %12, %14 : vector<8x128xf32>
    %16 = vector.broadcast %6 : f32 to vector<8x128xf32>
    %17 = arith.mulf %16, %10 : vector<8x128xf32>
    %18 = arith.addf %15, %17 : vector<8x128xf32>
    %19 = vector.broadcast %7 : f32 to vector<8x128xf32>
    %20 = arith.addf %18, %19 : vector<8x128xf32>
    %21 = math.tanh %20 : vector<8x128xf32>
    %c0_13 = arith.constant 0 : index
    %c0_14 = arith.constant 0 : index
    %22 = vector.load %arg7[%c0_13, %c0_14] : memref<8x256xf32, #tpu.memory_space<vmem>>, vector<8x128xf32>
    tpu.vector_store %arg7[%c0_13, %c0_14], %21 {strides = array<i32>} : memref<8x256xf32, #tpu.memory_space<vmem>>, vector<8x128xf32>,
    %c0_15 = arith.constant 0 : index
    %c0_16 = arith.constant 0 : index
    %23 = vector.load %arg7[%c0_15, %c0_16] : memref<8x256xf32, #tpu.memory_space<vmem>>, vector<8x128xf32>
    %c0_17 = arith.constant 0 : index
    %c1_18 = arith.constant 1 : index
    %24 = vector.load %arg7[%c0_17, %c1_18] : memref<8x256xf32, #tpu.memory_space<vmem>>, vector<8x128xf32>
    %c0_19 = arith.constant 0 : index
    %c2_20 = arith.constant 2 : index
    %25 = vector.load %arg7[%c0_19, %c2_20] : memref<8x256xf32, #tpu.memory_space<vmem>>, vector<8x128xf32>
    %26 = vector.broadcast %4 : f32 to vector<8x128xf32>
    %27 = arith.mulf %26, %23 : vector<8x128xf32>
    %28 = vector.broadcast %5 : f32 to vector<8x128xf32>
    %29 = arith.mulf %28, %24 : vector<8x128xf32>
    %30 = arith.addf %27, %29 : vector<8x128xf32>
    %31 = vector.broadcast %6 : f32 to vector<8x128xf32>
    %32 = arith.mulf %31, %25 : vector<8x128xf32>
    %33 = arith.addf %30, %32 : vector<8x128xf32>
    %34 = vector.broadcast %7 : f32 to vector<8x128xf32>
    %35 = arith.addf %33, %34 : vector<8x128xf32>
    %36 = math.tanh %35 : vector<8x128xf32>
    %c0_21 = arith.constant 0 : index
    %c0_22 = arith.constant 0 : index
    %37 = vector.load %arg7[%c0_21, %c0_22] : memref<8x256xf32, #tpu.memory_space<vmem>>, vector<8x128xf32>
    tpu.vector_store %arg7[%c0_21, %c0_22], %36 {strides = array<i32>} : memref<8x256xf32, #tpu.memory_space<vmem>>, vector<8x128xf32>,
    %c0_23 = arith.constant 0 : index
    %c0_24 = arith.constant 0 : index
    %38 = vector.load %arg7[%c0_23, %c0_24] : memref<8x256xf32, #tpu.memory_space<vmem>>, vector<8x128xf32>
    %c0_25 = arith.constant 0 : index
    %c1_26 = arith.constant 1 : index
    %39 = vector.load %arg7[%c0_25, %c1_26] : memref<8x256xf32, #tpu.memory_space<vmem>>, vector<8x128xf32>
    %c0_27 = arith.constant 0 : index
    %c2_28 = arith.constant 2 : index
    %40 = vector.load %arg7[%c0_27, %c2_28] : memref<8x256xf32, #tpu.memory_space<vmem>>, vector<8x128xf32>
    %41 = vector.broadcast %4 : f32 to vector<8x128xf32>
    %42 = arith.mulf %41, %38 : vector<8x128xf32>
    %43 = vector.broadcast %5 : f32 to vector<8x128xf32>
    %44 = arith.mulf %43, %39 : vector<8x128xf32>
    %45 = arith.addf %42, %44 : vector<8x128xf32>
    %46 = vector.broadcast %6 : f32 to vector<8x128xf32>
    %47 = arith.mulf %46, %40 : vector<8x128xf32>
    %48 = arith.addf %45, %47 : vector<8x128xf32>
    %49 = vector.broadcast %7 : f32 to vector<8x128xf32>
    %50 = arith.addf %48, %49 : vector<8x128xf32>
    %51 = math.tanh %50 : vector<8x128xf32>
    %c0_29 = arith.constant 0 : index
    %c0_30 = arith.constant 0 : index
    %52 = vector.load %arg7[%c0_29, %c0_30] : memref<8x256xf32, #tpu.memory_space<vmem>>, vector<8x128xf32>
    tpu.vector_store %arg7[%c0_29, %c0_30], %51 {strides = array<i32>} : memref<8x256xf32, #tpu.memory_space<vmem>>, vector<8x128xf32>,
    %c0_31 = arith.constant 0 : index
    %c0_32 = arith.constant 0 : index
    %53 = vector.load %arg7[%c0_31, %c0_32] : memref<8x256xf32, #tpu.memory_space<vmem>>, vector<8x128xf32>
    %c0_33 = arith.constant 0 : index
    %c0_34 = arith.constant 0 : index
    %54 = vector.load %arg4[%c0_33, %c0_34] : memref<128x128xf32, #tpu.memory_space<vmem>>, vector<128x128xf32>
    %cst_35 = arith.constant dense<0.000000e+00> : vector<8x128xf32>
    %55 = tpu.matmul %53, %54, %cst_35 {dimension_numbers = #tpu.dot_dimension_numbers<[1], [0], [0], [1], [0, 0, 1, 1], [], []>} : vector<8x128xf32>, vector<128x128xf32>, vector<8x128xf32> -> vector<8x128xf32>
    %c0_36 = arith.constant 0 : index
    %c0_37 = arith.constant 0 : index
    %56 = vector.load %arg5[%c0_36, %c0_37] : memref<1x128xf32, #tpu.memory_space<vmem>>, vector<1x128xf32>
    %57 = vector.broadcast %56 : vector<1x128xf32> to vector<8x128xf32>
    %58 = arith.addf %55, %57 : vector<8x128xf32>
    %c0_38 = arith.constant 0 : index
    %c0_39 = arith.constant 0 : index
    %59 = vector.load %arg6[%c0_38, %c0_39] : memref<8x128xf32, #tpu.memory_space<vmem>>, vector<8x128xf32>
    tpu.vector_store %arg6[%c0_38, %c0_39], %58 {strides = array<i32>} : memref<8x128xf32, #tpu.memory_space<vmem>>, vector<8x128xf32>,
    return
  }
  func.func @transform_0(%arg0: i32) -> i32 {
    %c0_i32 = arith.constant 0 : i32
    %c0_i32_0 = arith.constant 0 : i32
    return %c0_i32 : i32
  }
  func.func @transform_1(%arg0: i32) -> i32 {
    %c0_i32 = arith.constant 0 : i32
    %c0_i32_0 = arith.constant 0 : i32
    return %c0_i32 : i32
  }
  func.func @transform_2(%arg0: i32) -> (i32, i32) {
    %c0_i32 = arith.constant 0 : i32
    %c0_i32_0 = arith.constant 0 : i32
    return %arg0, %c0_i32 : i32, i32
  }
  func.func @transform_3(%arg0: i32) -> (i32, i32) {
    %c0_i32 = arith.constant 0 : i32
    %c0_i32_0 = arith.constant 0 : i32
    %c0_i32_1 = arith.constant 0 : i32
    return %c0_i32, %c0_i32_0 : i32, i32
  }
  func.func @transform_4(%arg0: i32) -> (i32, i32) {
    %c0_i32 = arith.constant 0 : i32
    %c0_i32_0 = arith.constant 0 : i32
    %c0_i32_1 = arith.constant 0 : i32
    return %c0_i32, %c0_i32_0 : i32, i32
  }
  func.func @transform_5(%arg0: i32) -> (i32, i32) {
    %c0_i32 = arith.constant 0 : i32
    %c0_i32_0 = arith.constant 0 : i32
    return %arg0, %c0_i32 : i32, i32
  }
}

</mosaic_0001>

<bundles_post_ra>
// kernel: tpu_custom_call.1
= control target key start
LH: loop header
LB: loop body
LE: loop exit
PB: predicated region body
PF: predicated region fallthrough
CT: control target
= control target key end

     0   :  { %11 = vsyncpa [#allocation7], 0  ;;  %s542_s0 = inlined_call_operand.vmem [shape: f32[3], index: 0, kind: input, shape index: {}]   ;;  %s543_s1 = inlined_call_operand.<no memory space> [shape: f32[1], index: 1, kind: input, shape index: {}]   ;;  %s544_s2 = inlined_call_operand.hbm [shape: f32[8,16], index: 2, kind: input, shape index: {}]   ;;  %s545_s3 = inlined_call_operand.hbm [shape: f32[128,128], index: 3, kind: input, shape index: {}]   ;;  %s546_s4 = inlined_call_operand.vmem [shape: f32[1,128], index: 4, kind: input, shape index: {}]   ;;  %s547_s5 = inlined_call_operand.hbm [shape: f32[8,128], index: 5, kind: output, shape index: {}]  }
   0x1   :  { %12 = vsyncpa [#allocation5], 0 }
   0x2   :  { %13 = vsyncpa [#allocation10], 0 }
   0x3   :  { %14 = vsyncpa [#allocation6], 0  ;;  %s21_s20 = sshll.u32 %s542_s0, 4  ;;  %s22_s20 = int_to_ptr.vmem [resolvable:$true] %s21_s20 }
   0x4   :  { %s346_s21 = scalar_lea.vmem %s22_s20, 16  ;;  %p351_p1 = scmp.lt.s32.totalorder %s22_s20, %s22_s20 }
   0x5   :  { %p347_p0 = scmp.ne.s32.totalorder %s22_s20, %s346_s21  ;;  %p352_p2 = scmp.lt.s32.totalorder %s346_s21, %s346_s21 }
   0x7   :  { %p353_p3 = por %p352_p2, %p351_p1 }
   0x9   :  { %p354_p4 = pnand %p353_p3, %p347_p0 }
   0xb   :  { %357 = shalt.err (!%p354_p4)
}
   0xc   :  { %s426_s22 = smov [#allocation4]   ;;  %s427_s23 = smov [#allocation8]  }
   0xd   :  { %24 = dma.vmem_to_smem %s22_s20, 16, %s426_s22, [#allocation7]  }
   0xe   :  { %s33_s24 = sshll.u32 %s427_s23, 4  ;;  %s428_s25 = smov [#allocation9]   ;;  %s34_s24 = int_to_ptr.vmem [resolvable:$true] %s33_s24 }
   0xf   :  { %s42_s26 = sshll.u32 %s428_s25, 4  ;;  %s366_s27 = scalar_lea.vmem %s34_s24, 128  ;;  %s43_s26 = int_to_ptr.vmem [resolvable:$true] %s42_s26 }
  0x10   :  { %p367_p5 = scmp.ne.s32.totalorder %s34_s24, %s366_s27  ;;  %p371_p6 = scmp.lt.s32.totalorder %s34_s24, %s34_s24 }
  0x11   :  { %p372_p7 = scmp.lt.s32.totalorder %s366_s27, %s366_s27 }
  0x13   :  { %p373_p8 = por %p372_p7, %p371_p6 }
  0x15   :  { %p374_p9 = pnand %p373_p8, %p367_p5 }
  0x17   :  { %377 = shalt.err (!%p374_p9)
}
  0x18   :  { %36 = dma.hbm_to_vmem [thread:$0]  %s544_s2, 128, %s34_s24, [#allocation5]  }
  0x19   :  { %s386_s29 = scalar_lea.vmem %s43_s26, 2048  ;;  %p391_p11 = scmp.lt.s32.totalorder %s43_s26, %s43_s26 }
  0x1a   :  { %p387_p10 = scmp.ne.s32.totalorder %s43_s26, %s386_s29  ;;  %p392_p12 = scmp.lt.s32.totalorder %s386_s29, %s386_s29 }
  0x1c   :  { %p393_p13 = por %p392_p12, %p391_p11 }
  0x1e   :  { %p394_p0 = pnand %p393_p13, %p387_p10 }
  0x20   :  { %397 = shalt.err (!%p394_p0)
}
  0x21   :  { %s429_s30 = smov 128   ;;  %s430_s6 = smov 8  }
  0x22   :  { %48 = dma.hbm_to_vmem [thread:$0]  %s545_s3, 2048, %s43_s26, [#allocation10], %s429_s30, %s429_s30, %s430_s6  }
  0x23   :  { %418 = dma.done.wait [#allocation7], 16  }
  0x24   :  { %419 = vsyncadd [#allocation7], 4294967280 }
  0x25   :  { %420 = dma.done.wait [#allocation5], 128  }
  0x26   :  { %421 = vsyncadd [#allocation5], 4294967168 }
  0x27   :  { %422 = dma.done.wait [#allocation10], 2048  }
  0x28   :  { %423 = vsyncadd [#allocation10], 4294965248 }
  0x29   :  { %60 = sfence }
  0x2a   :  { %v63_v0 = vld [vmem:[#allocation8] sm:$0xff]  ;;  %vm64_vm0 = vcmask 130048   ;;  %s276_s2 = sld [smem:[#allocation4 + $0x2]]  ;;  %v431_v1 = vmov 0.0   ;;  %s432_s3 = smov 126   ;;  %vm84_vm1 = vcmask 1039360   ;;  %v501_v18 = vstv %s543_s1 }
  0x2b   :  { %61 = vst [vmem:[#allocation2] sm:$0xff] %v431_v1  ;;  %s275_s9 = sld [smem:[#allocation4 + $0x1]]  ;;  %295 = vmatprep.subr.mxu0 %v431_v1  ;;  %s433_s10 = smov 127   ;;  %vm97_vm2 = vcmask 1031168   ;;  %v179_v31 = vld [vmem:[#allocation9 + $0x78] sm:$0xff]  ;;  %v178_v34 = vld [vmem:[#allocation9 + $0x70] sm:$0xff] }
  0x2c   :  { %65 = vst.msk [vmem:[#allocation2] sm:$0xff] %vm64_vm0, %v63_v0  ;;  %s66_s11 = sld [smem:[#allocation4]]  ;;  %296 = vmatpush3.msra.mxu0 %v179_v31  ;;  %v177_v36 = vld [vmem:[#allocation9 + $0x68] sm:$0xff]  ;;  %v176_v37 = vld [vmem:[#allocation9 + $0x60] sm:$0xff]  ;;  %v175_v38 = vld [vmem:[#allocation9 + $0x58] sm:$0xff]  ;;  %vm434_vm3 = vmmov 0  }
  0x2d   :  { %297 = vmatprep.subr.mxu0 %v431_v1  ;;  %v174_v39 = vld [vmem:[#allocation9 + $0x50] sm:$0xff]  ;;  %v173_v40 = vld [vmem:[#allocation9 + $0x48] sm:$0xff]  ;;  %v172_v41 = vld [vmem:[#allocation9 + $0x40] sm:$0xff]  ;;  %327 = vmatprep.mubr.msk.f32.mxu0 %vm434_vm3, %v431_v1  ;;  %s435_s15 = smov [#allocation11]  }
  0x2e   :  { %298 = vmatpush3.msra.mxu0 %v178_v34  ;;  %v171_v42 = vld [vmem:[#allocation9 + $0x38] sm:$0xff]  ;;  %v170_v43 = vld [vmem:[#allocation9 + $0x30] sm:$0xff]  ;;  %v169_v46 = vld [vmem:[#allocation9 + $0x28] sm:$0xff]  ;;  %s264_s16 = sshll.u32 %s435_s15, 4  ;;  %s265_s16 = int_to_ptr.vmem [resolvable:$true] %s264_s16 }
  0x2f   :  { %299 = vmatprep.subr.mxu0 %v431_v1  ;;  %v168_v47 = vld [vmem:[#allocation9 + $0x20] sm:$0xff]  ;;  %v167_v49 = vld [vmem:[#allocation9 + $0x18] sm:$0xff]  ;;  %v166_v50 = vld [vmem:[#allocation9 + $0x10] sm:$0xff]  ;;  %s398_s17 = scalar_lea.vmem %s265_s16, 128  ;;  %p403_p2 = scmp.lt.s32.totalorder %s265_s16, %s265_s16 }
  0x30   :  { %v477_v2 = vstv %s276_s2  ;;  %300 = vmatpush3.msra.mxu0 %v177_v36  ;;  %v165_v51 = vld [vmem:[#allocation9 + $0x8] sm:$0xff]  ;;  %v164_v52 = vld [vmem:[#allocation9] sm:$0xff]  ;;  %p399_p1 = scmp.ne.s32.totalorder %s265_s16, %s398_s17  ;;  %p404_p3 = scmp.lt.s32.totalorder %s398_s17, %s398_s17 }
  0x31   :  { %v479_v3 = vstv %s275_s9  ;;  %v90_v7 = vmul.f32 0.0, %v477_v2  ;;  %301 = vmatprep.subr.mxu0 %v431_v1  ;;  %v277_v0 = vld [vmem:[%s546_s4] ss:$0 sm:$0xff] }
  0x32   :  { %v77_v8 = vmul.f32 0.0, %v479_v3  ;;  %v493_v9 = vstv %s66_s11  ;;  %302 = vmatpush3.msra.mxu0 %v176_v37  ;;  %p405_p4 = por %p404_p3, %p403_p2 }
  0x33   :  { %v71_v4 = vld [vmem:[#allocation2] sm:$0xff]  ;;  %303 = vmatprep.subr.mxu0 %v431_v1 }
  0x34   :  { %v89_v5 = vmul.f32 %v477_v2, %v71_v4  ;;  %v76_v6 = vmul.f32 %v479_v3, %v71_v4  ;;  %v74_v12 = vmul.f32 %v493_v9, %v71_v4  ;;  %304 = vmatpush3.msra.mxu0 %v175_v38  ;;  %p406_p5 = pnand %p405_p4, %p399_p1 }
  0x35   :  { %305 = vmatprep.subr.mxu0 %v431_v1 }
  0x36   :  { %93 = vrot.lane.b32.xlu1 %v89_v5, %s432_s3  ;;  %80 = vrot.lane.b32.xlu0 %v76_v6, %s433_s10 }
  0x37   :  { %306 = vmatpush3.msra.mxu0 %v174_v39 }
  0x38   :  { %307 = vmatprep.subr.mxu0 %v431_v1 }
  0x39   :  { %308 = vmatpush3.msra.mxu0 %v173_v40 }
  0x3a   :  { %95 = vrot.lane.b32.xlu1 %v90_v7, %s432_s3  ;;  %82 = vrot.lane.b32.xlu0 %v77_v8, %s433_s10 }
  0x3b   :  { %309 = vmatprep.subr.mxu0 %v431_v1 }
  0x3c   :  { %310 = vmatpush3.msra.mxu0 %v172_v41 }
  0x3d   :  { %311 = vmatprep.subr.mxu0 %v431_v1 }
  0x3e   :  { %115 = vrot.lane.b32.xlu1 %v77_v8, %s433_s10  ;;  %312 = vmatpush3.msra.mxu0 %v171_v42 }
  0x3f   :  { %313 = vmatprep.subr.mxu0 %v431_v1 }
  0x40   :  { %314 = vmatpush3.msra.mxu0 %v170_v43 }
  0x41   :  { %315 = vmatprep.subr.mxu0 %v431_v1 }
  0x42   :  { %126 = vrot.lane.b32.xlu1 %v90_v7, %s432_s3  ;;  %316 = vmatpush3.msra.mxu0 %v169_v46 }
  0x43   :  { %317 = vmatprep.subr.mxu0 %v431_v1 }
  0x44   :  { %318 = vmatpush3.msra.mxu0 %v168_v47 }
  0x45   :  { %319 = vmatprep.subr.mxu0 %v431_v1 }
  0x46   :  { %144 = vrot.lane.b32.xlu1 %v77_v8, %s433_s10  ;;  %320 = vmatpush3.msra.mxu0 %v167_v49 }
  0x47   :  { %321 = vmatprep.subr.mxu0 %v431_v1 }
  0x48   :  { %322 = vmatpush3.msra.mxu0 %v166_v50 }
  0x49   :  { %323 = vmatprep.subr.mxu0 %v431_v1 }
  0x4a   :  { %155 = vrot.lane.b32.xlu1 %v90_v7, %s432_s3  ;;  %324 = vmatpush3.msra.mxu0 %v165_v51 }
  0x4b   :  { %325 = vmatprep.subr.mxu0 %v431_v1 }
  0x4c   :  { %326 = vmatpush3.msra.mxu0 %v164_v52 }
  0xa8   :  { %v94_v10 = vpop.permute.xlu1 %93  ;;  %v81_v11 = vpop.permute.xlu0 %80 }
  0xac   :  { %v96_v13 = vpop.permute.xlu1 %95  ;;  %v83_v14 = vpop.permute.xlu0 %82 }
  0xad   :  { %v85_v15 = vsel %vm84_vm1, %v81_v11, %v83_v14  ;;  %v98_v17 = vsel %vm97_vm2, %v94_v10, %v96_v13 }
  0xae   :  { %v87_v16 = vadd.f32 %v85_v15, %v74_v12 }
  0xb0   :  { %v100_v19 = vadd.f32 %v98_v17, %v87_v16  ;;  %v116_v24 = vpop.permute.xlu1 %115 }
  0xb2   :  { %v102_v20 = vadd.f32 %v501_v18, %v100_v19 }
  0xb4   :  { %340 = vtanh.f32 %v102_v20  ;;  %v127_v28 = vpop.permute.xlu1 %126 }
  0xb8   :  { %v145_v53 = vpop.permute.xlu1 %144 }
  0xbc   :  { %v156_v57 = vpop.permute.xlu1 %155 }
  0xc1   :  { %v341_v21 = vpop.eup %340 }
  0xc2   :  { %v109_v22 = vmul.f32 %v341_v21, %v479_v3  ;;  %v120_v23 = vmul.f32 %v341_v21, %v477_v2  ;;  %v108_v27 = vmul.f32 %v341_v21, %v493_v9 }
  0xc4   :  { %113 = vrot.lane.b32.xlu0 %v109_v22, %s433_s10 }
  0xc8   :  { %124 = vrot.lane.b32.xlu0 %v120_v23, %s432_s3 }
 0x136   :  { %v114_v25 = vpop.permute.xlu0 %113 }
 0x137   :  { %v117_v26 = vsel %vm84_vm1, %v114_v25, %v116_v24 }
 0x138   :  { %v119_v29 = vadd.f32 %v117_v26, %v108_v27 }
 0x13a   :  { %v125_v30 = vpop.permute.xlu0 %124 }
 0x13b   :  { %v128_v32 = vsel %vm97_vm2, %v125_v30, %v127_v28 }
 0x13c   :  { %v130_v33 = vadd.f32 %v128_v32, %v119_v29 }
 0x13e   :  { %v131_v35 = vadd.f32 %v130_v33, %v501_v18 }
 0x140   :  { %342 = vtanh.f32 %v131_v35 }
 0x14d   :  { %v343_v44 = vpop.eup %342 }
 0x14e   :  { %v138_v45 = vmul.f32 %v343_v44, %v479_v3  ;;  %v149_v48 = vmul.f32 %v343_v44, %v477_v2  ;;  %v137_v56 = vmul.f32 %v343_v44, %v493_v9 }
 0x150   :  { %142 = vrot.lane.b32.xlu0 %v138_v45, %s433_s10 }
 0x154   :  { %153 = vrot.lane.b32.xlu0 %v149_v48, %s432_s3 }
 0x1c2   :  { %v143_v54 = vpop.permute.xlu0 %142 }
 0x1c3   :  { %v146_v55 = vsel %vm84_vm1, %v143_v54, %v145_v53 }
 0x1c4   :  { %v148_v58 = vadd.f32 %v146_v55, %v137_v56 }
 0x1c6   :  { %v154_v59 = vpop.permute.xlu0 %153 }
 0x1c7   :  { %v157_v60 = vsel %vm97_vm2, %v154_v59, %v156_v57 }
 0x1c8   :  { %v159_v61 = vadd.f32 %v157_v60, %v148_v58 }
 0x1ca   :  { %v160_v62 = vadd.f32 %v159_v61, %v501_v18 }
 0x1cc   :  { %344 = vtanh.f32 %v160_v62 }
 0x1d9   :  { %v345_v63 = vpop.eup %344 }
 0x1da   :  { %162 = vst [vmem:[#allocation2] sm:$0xff] %v345_v63  ;;  %328 = vmatmul.mubr.f32.vlgmr.msra.gmra.mxu0 %v345_v63 }
 0x29a   :  { %v253_v1 = vpop.f32.mrf.mxu0 }
 0x29b   :  { %v254_v2 = vadd.f32 %v277_v0, %v253_v1 }
 0x29c   :  { %v329_v3 = vpop.f32.mrf.mxu0 }
 0x29d   :  { %257 = vst [vmem:[#allocation11] sm:$0xff] %v254_v2 }
 0x29e   :  { %409 = shalt.err (!%p406_p5)
}
 0x29f   :  { %267 = dma.vmem_to_hbm [thread:$0]  %s265_s16, 128, %s547_s5, [#allocation6]  }
 0x2a0   :  { %424 = dma.done.wait [#allocation6], 128  }
 0x2a1   :  { %425 = vsyncadd [#allocation6], 4294967168 }
 0x2a2   :  { %271 = vsyncpa [#allocation5], 1 }
 0x2a3   :  { %272 = vsyncpa [#allocation10], 1 }
 0x2a4   :  { %273 = vsyncpa [#allocation6], 1 }
 0x2a5   :  { %274 = vsyncpa [#allocation7], 1 }

// kernel: tpu_custom_call.1
= control target key start
LH: loop header
LB: loop body
LE: loop exit
PB: predicated region body
PF: predicated region fallthrough
CT: control target
= control target key end

     0   :  { %11 = vsyncpa [#allocation7], 0  ;;  %s542_s0 = inlined_call_operand.vmem [shape: f32[3], index: 0, kind: input, shape index: {}]   ;;  %s543_s1 = inlined_call_operand.<no memory space> [shape: f32[1], index: 1, kind: input, shape index: {}]   ;;  %s544_s2 = inlined_call_operand.hbm [shape: f32[8,16], index: 2, kind: input, shape index: {}]   ;;  %s545_s3 = inlined_call_operand.hbm [shape: f32[128,128], index: 3, kind: input, shape index: {}]   ;;  %s546_s4 = inlined_call_operand.vmem [shape: f32[1,128], index: 4, kind: input, shape index: {}]   ;;  %s547_s5 = inlined_call_operand.hbm [shape: f32[8,128], index: 5, kind: output, shape index: {}]  }
   0x1   :  { %12 = vsyncpa [#allocation5], 0 }
   0x2   :  { %13 = vsyncpa [#allocation10], 0 }
   0x3   :  { %14 = vsyncpa [#allocation6], 0  ;;  %s21_s20 = sshll.u32 %s542_s0, 4  ;;  %s22_s20 = int_to_ptr.vmem [resolvable:$true] %s21_s20 }
   0x4   :  { %s346_s21 = scalar_lea.vmem %s22_s20, 16  ;;  %p351_p1 = scmp.lt.s32.totalorder %s22_s20, %s22_s20 }
   0x5   :  { %p347_p0 = scmp.ne.s32.totalorder %s22_s20, %s346_s21  ;;  %p352_p2 = scmp.lt.s32.totalorder %s346_s21, %s346_s21 }
   0x7   :  { %p353_p3 = por %p352_p2, %p351_p1 }
   0x9   :  { %p354_p4 = pnand %p353_p3, %p347_p0 }
   0xb   :  { %357 = shalt.err (!%p354_p4)
}
   0xc   :  { %s426_s22 = smov [#allocation4]   ;;  %s427_s23 = smov [#allocation8]  }
   0xd   :  { %24 = dma.vmem_to_smem %s22_s20, 16, %s426_s22, [#allocation7]  }
   0xe   :  { %s33_s24 = sshll.u32 %s427_s23, 4  ;;  %s428_s25 = smov [#allocation9]   ;;  %s34_s24 = int_to_ptr.vmem [resolvable:$true] %s33_s24 }
   0xf   :  { %s42_s26 = sshll.u32 %s428_s25, 4  ;;  %s366_s27 = scalar_lea.vmem %s34_s24, 128  ;;  %s43_s26 = int_to_ptr.vmem [resolvable:$true] %s42_s26 }
  0x10   :  { %p367_p5 = scmp.ne.s32.totalorder %s34_s24, %s366_s27  ;;  %p371_p6 = scmp.lt.s32.totalorder %s34_s24, %s34_s24 }
  0x11   :  { %p372_p7 = scmp.lt.s32.totalorder %s366_s27, %s366_s27 }
  0x13   :  { %p373_p8 = por %p372_p7, %p371_p6 }
  0x15   :  { %p374_p9 = pnand %p373_p8, %p367_p5 }
  0x17   :  { %377 = shalt.err (!%p374_p9)
}
  0x18   :  { %36 = dma.hbm_to_vmem [thread:$0]  %s544_s2, 128, %s34_s24, [#allocation5]  }
  0x19   :  { %s386_s29 = scalar_lea.vmem %s43_s26, 2048  ;;  %p391_p11 = scmp.lt.s32.totalorder %s43_s26, %s43_s26 }
  0x1a   :  { %p387_p10 = scmp.ne.s32.totalorder %s43_s26, %s386_s29  ;;  %p392_p12 = scmp.lt.s32.totalorder %s386_s29, %s386_s29 }
  0x1c   :  { %p393_p13 = por %p392_p12, %p391_p11 }
  0x1e   :  { %p394_p0 = pnand %p393_p13, %p387_p10 }
  0x20   :  { %397 = shalt.err (!%p394_p0)
}
  0x21   :  { %s429_s30 = smov 128   ;;  %s430_s6 = smov 8  }
  0x22   :  { %48 = dma.hbm_to_vmem [thread:$0]  %s545_s3, 2048, %s43_s26, [#allocation10], %s429_s30, %s429_s30, %s430_s6  }
  0x23   :  { %418 = dma.done.wait [#allocation7], 16  }
  0x24   :  { %419 = vsyncadd [#allocation7], 4294967280 }
  0x25   :  { %420 = dma.done.wait [#allocation5], 128  }
  0x26   :  { %421 = vsyncadd [#allocation5], 4294967168 }
  0x27   :  { %422 = dma.done.wait [#allocation10], 2048  }
  0x28   :  { %423 = vsyncadd [#allocation10], 4294965248 }
  0x29   :  { %60 = sfence }
  0x2a   :  { %v63_v0 = vld [vmem:[#allocation8] sm:$0xff]  ;;  %vm64_vm0 = vcmask 130048   ;;  %s276_s2 = sld [smem:[#allocation4 + $0x2]]  ;;  %v431_v1 = vmov 0.0   ;;  %s432_s3 = smov 126   ;;  %vm84_vm1 = vcmask 1039360   ;;  %v501_v18 = vstv %s543_s1 }
  0x2b   :  { %61 = vst [vmem:[#allocation2] sm:$0xff] %v431_v1  ;;  %s275_s9 = sld [smem:[#allocation4 + $0x1]]  ;;  %295 = vmatprep.subr.mxu0 %v431_v1  ;;  %s433_s10 = smov 127   ;;  %vm97_vm2 = vcmask 1031168   ;;  %v179_v31 = vld [vmem:[#allocation9 + $0x78] sm:$0xff]  ;;  %v178_v34 = vld [vmem:[#allocation9 + $0x70] sm:$0xff] }
  0x2c   :  { %65 = vst.msk [vmem:[#allocation2] sm:$0xff] %vm64_vm0, %v63_v0  ;;  %s66_s11 = sld [smem:[#allocation4]]  ;;  %296 = vmatpush3.msra.mxu0 %v179_v31  ;;  %v177_v36 = vld [vmem:[#allocation9 + $0x68] sm:$0xff]  ;;  %v176_v37 = vld [vmem:[#allocation9 + $0x60] sm:$0xff]  ;;  %v175_v38 = vld [vmem:[#allocation9 + $0x58] sm:$0xff]  ;;  %vm434_vm3 = vmmov 0  }
  0x2d   :  { %297 = vmatprep.subr.mxu0 %v431_v1  ;;  %v174_v39 = vld [vmem:[#allocation9 + $0x50] sm:$0xff]  ;;  %v173_v40 = vld [vmem:[#allocation9 + $0x48] sm:$0xff]  ;;  %v172_v41 = vld [vmem:[#allocation9 + $0x40] sm:$0xff]  ;;  %327 = vmatprep.mubr.msk.f32.mxu0 %vm434_vm3, %v431_v1  ;;  %s435_s15 = smov [#allocation11]  }
  0x2e   :  { %298 = vmatpush3.msra.mxu0 %v178_v34  ;;  %v171_v42 = vld [vmem:[#allocation9 + $0x38] sm:$0xff]  ;;  %v170_v43 = vld [vmem:[#allocation9 + $0x30] sm:$0xff]  ;;  %v169_v46 = vld [vmem:[#allocation9 + $0x28] sm:$0xff]  ;;  %s264_s16 = sshll.u32 %s435_s15, 4  ;;  %s265_s16 = int_to_ptr.vmem [resolvable:$true] %s264_s16 }
  0x2f   :  { %299 = vmatprep.subr.mxu0 %v431_v1  ;;  %v168_v47 = vld [vmem:[#allocation9 + $0x20] sm:$0xff]  ;;  %v167_v49 = vld [vmem:[#allocation9 + $0x18] sm:$0xff]  ;;  %v166_v50 = vld [vmem:[#allocation9 + $0x10] sm:$0xff]  ;;  %s398_s17 = scalar_lea.vmem %s265_s16, 128  ;;  %p403_p2 = scmp.lt.s32.totalorder %s265_s16, %s265_s16 }
  0x30   :  { %v477_v2 = vstv %s276_s2  ;;  %300 = vmatpush3.msra.mxu0 %v177_v36  ;;  %v165_v51 = vld [vmem:[#allocation9 + $0x8] sm:$0xff]  ;;  %v164_v52 = vld [vmem:[#allocation9] sm:$0xff]  ;;  %p399_p1 = scmp.ne.s32.totalorder %s265_s16, %s398_s17  ;;  %p404_p3 = scmp.lt.s32.totalorder %s398_s17, %s398_s17 }
  0x31   :  { %v479_v3 = vstv %s275_s9  ;;  %v90_v7 = vmul.f32 0.0, %v477_v2  ;;  %301 = vmatprep.subr.mxu0 %v431_v1  ;;  %v277_v0 = vld [vmem:[%s546_s4] ss:$0 sm:$0xff] }
  0x32   :  { %v77_v8 = vmul.f32 0.0, %v479_v3  ;;  %v493_v9 = vstv %s66_s11  ;;  %302 = vmatpush3.msra.mxu0 %v176_v37  ;;  %p405_p4 = por %p404_p3, %p403_p2 }
  0x33   :  { %v71_v4 = vld [vmem:[#allocation2] sm:$0xff]  ;;  %303 = vmatprep.subr.mxu0 %v431_v1 }
  0x34   :  { %v89_v5 = vmul.f32 %v477_v2, %v71_v4  ;;  %v76_v6 = vmul.f32 %v479_v3, %v71_v4  ;;  %v74_v12 = vmul.f32 %v493_v9, %v71_v4  ;;  %304 = vmatpush3.msra.mxu0 %v175_v38  ;;  %p406_p5 = pnand %p405_p4, %p399_p1 }
  0x35   :  { %305 = vmatprep.subr.mxu0 %v431_v1 }
  0x36   :  { %93 = vrot.lane.b32.xlu1 %v89_v5, %s432_s3  ;;  %80 = vrot.lane.b32.xlu0 %v76_v6, %s433_s10 }
  0x37   :  { %306 = vmatpush3.msra.mxu0 %v174_v39 }
  0x38   :  { %307 = vmatprep.subr.mxu0 %v431_v1 }
  0x39   :  { %308 = vmatpush3.msra.mxu0 %v173_v40 }
  0x3a   :  { %95 = vrot.lane.b32.xlu1 %v90_v7, %s432_s3  ;;  %82 = vrot.lane.b32.xlu0 %v77_v8, %s433_s10 }
  0x3b   :  { %309 = vmatprep.subr.mxu0 %v431_v1 }
  0x3c   :  { %310 = vmatpush3.msra.mxu0 %v172_v41 }
  0x3d   :  { %311 = vmatprep.subr.mxu0 %v431_v1 }
  0x3e   :  { %115 = vrot.lane.b32.xlu1 %v77_v8, %s433_s10  ;;  %312 = vmatpush3.msra.mxu0 %v171_v42 }
  0x3f   :  { %313 = vmatprep.subr.mxu0 %v431_v1 }
  0x40   :  { %314 = vmatpush3.msra.mxu0 %v170_v43 }
  0x41   :  { %315 = vmatprep.subr.mxu0 %v431_v1 }
  0x42   :  { %126 = vrot.lane.b32.xlu1 %v90_v7, %s432_s3  ;;  %316 = vmatpush3.msra.mxu0 %v169_v46 }
  0x43   :  { %317 = vmatprep.subr.mxu0 %v431_v1 }
  0x44   :  { %318 = vmatpush3.msra.mxu0 %v168_v47 }
  0x45   :  { %319 = vmatprep.subr.mxu0 %v431_v1 }
  0x46   :  { %144 = vrot.lane.b32.xlu1 %v77_v8, %s433_s10  ;;  %320 = vmatpush3.msra.mxu0 %v167_v49 }
  0x47   :  { %321 = vmatprep.subr.mxu0 %v431_v1 }
  0x48   :  { %322 = vmatpush3.msra.mxu0 %v166_v50 }
  0x49   :  { %323 = vmatprep.subr.mxu0 %v431_v1 }
  0x4a   :  { %155 = vrot.lane.b32.xlu1 %v90_v7, %s432_s3  ;;  %324 = vmatpush3.msra.mxu0 %v165_v51 }
  0x4b   :  { %325 = vmatprep.subr.mxu0 %v431_v1 }
  0x4c   :  { %326 = vmatpush3.msra.mxu0 %v164_v52 }
  0xa8   :  { %v94_v10 = vpop.permute.xlu1 %93  ;;  %v81_v11 = vpop.permute.xlu0 %80 }
  0xac   :  { %v96_v13 = vpop.permute.xlu1 %95  ;;  %v83_v14 = vpop.permute.xlu0 %82 }
  0xad   :  { %v85_v15 = vsel %vm84_vm1, %v81_v11, %v83_v14  ;;  %v98_v17 = vsel %vm97_vm2, %v94_v10, %v96_v13 }
  0xae   :  { %v87_v16 = vadd.f32 %v85_v15, %v74_v12 }
  0xb0   :  { %v100_v19 = vadd.f32 %v98_v17, %v87_v16  ;;  %v116_v24 = vpop.permute.xlu1 %115 }
  0xb2   :  { %v102_v20 = vadd.f32 %v501_v18, %v100_v19 }
  0xb4   :  { %340 = vtanh.f32 %v102_v20  ;;  %v127_v28 = vpop.permute.xlu1 %126 }
  0xb8   :  { %v145_v53 = vpop.permute.xlu1 %144 }
  0xbc   :  { %v156_v57 = vpop.permute.xlu1 %155 }
  0xc1   :  { %v341_v21 = vpop.eup %340 }
  0xc2   :  { %v109_v22 = vmul.f32 %v341_v21, %v479_v3  ;;  %v120_v23 = vmul.f32 %v341_v21, %v477_v2  ;;  %v108_v27 = vmul.f32 %v341_v21, %v493_v9 }
  0xc4   :  { %113 = vrot.lane.b32.xlu0 %v109_v22, %s433_s10 }
  0xc8   :  { %124 = vrot.lane.b32.xlu0 %v120_v23, %s432_s3 }
 0x136   :  { %v114_v25 = vpop.permute.xlu0 %113 }
 0x137   :  { %v117_v26 = vsel %vm84_vm1, %v114_v25, %v116_v24 }
 0x138   :  { %v119_v29 = vadd.f32 %v117_v26, %v108_v27 }
 0x13a   :  { %v125_v30 = vpop.permute.xlu0 %124 }
 0x13b   :  { %v128_v32 = vsel %vm97_vm2, %v125_v30, %v127_v28 }
 0x13c   :  { %v130_v33 = vadd.f32 %v128_v32, %v119_v29 }
 0x13e   :  { %v131_v35 = vadd.f32 %v130_v33, %v501_v18 }
 0x140   :  { %342 = vtanh.f32 %v131_v35 }
 0x14d   :  { %v343_v44 = vpop.eup %342 }
 0x14e   :  { %v138_v45 = vmul.f32 %v343_v44, %v479_v3  ;;  %v149_v48 = vmul.f32 %v343_v44, %v477_v2  ;;  %v137_v56 = vmul.f32 %v343_v44, %v493_v9 }
 0x150   :  { %142 = vrot.lane.b32.xlu0 %v138_v45, %s433_s10 }
 0x154   :  { %153 = vrot.lane.b32.xlu0 %v149_v48, %s432_s3 }
 0x1c2   :  { %v143_v54 = vpop.permute.xlu0 %142 }
 0x1c3   :  { %v146_v55 = vsel %vm84_vm1, %v143_v54, %v145_v53 }
 0x1c4   :  { %v148_v58 = vadd.f32 %v146_v55, %v137_v56 }
 0x1c6   :  { %v154_v59 = vpop.permute.xlu0 %153 }
 0x1c7   :  { %v157_v60 = vsel %vm97_vm2, %v154_v59, %v156_v57 }
 0x1c8   :  { %v159_v61 = vadd.f32 %v157_v60, %v148_v58 }
 0x1ca   :  { %v160_v62 = vadd.f32 %v159_v61, %v501_v18 }
 0x1cc   :  { %344 = vtanh.f32 %v160_v62 }
 0x1d9   :  { %v345_v63 = vpop.eup %344 }
 0x1da   :  { %162 = vst [vmem:[#allocation2] sm:$0xff] %v345_v63  ;;  %328 = vmatmul.mubr.f32.vlgmr.msra.gmra.mxu0 %v345_v63 }
 0x29a   :  { %v253_v1 = vpop.f32.mrf.mxu0 }
 0x29b   :  { %v254_v2 = vadd.f32 %v277_v0, %v253_v1 }
 0x29c   :  { %v329_v3 = vpop.f32.mrf.mxu0 }
 0x29d   :  { %257 = vst [vmem:[#allocation11] sm:$0xff] %v254_v2 }
 0x29e   :  { %409 = shalt.err (!%p406_p5)
}
 0x29f   :  { %267 = dma.vmem_to_hbm [thread:$0]  %s265_s16, 128, %s547_s5, [#allocation6]  }
 0x2a0   :  { %424 = dma.done.wait [#allocation6], 128  }
 0x2a1   :  { %425 = vsyncadd [#allocation6], 4294967168 }
 0x2a2   :  { %271 = vsyncpa [#allocation5], 1 }
 0x2a3   :  { %272 = vsyncpa [#allocation10], 1 }
 0x2a4   :  { %273 = vsyncpa [#allocation6], 1 }
 0x2a5   :  { %274 = vsyncpa [#allocation7], 1 }

</bundles_post_ra>
